<compile_context>
chip_gen: v6e
topology: v6e:2x2x1
jax: 0.10.0
libtpu: 0.0.40
codegen_flags: <defaults>
</compile_context>

<pallas_src>
import functools

import jax
import jax.numpy as jnp
from jax.experimental import pallas as pl
from jax.experimental.pallas import tpu as pltpu


_HIDDEN = 18          # first-layer width, fixed by the module
_NEG_SLOPE = 0.01     # PyTorch LeakyReLU default negative_slope

# VMEM budget for the double-buffered x / out blocks.  Chosen to fit v7x's
# 64 MiB physical VMEM (32 MiB scoped default) with headroom; v5e/v6e have
# 128 MiB so this is safe there too (v5e's 16 MiB scoped default is overridden
# explicitly below).
_VMEM_BLOCK_BUDGET = 28 * 1024 * 1024
_VMEM_LIMIT_BYTES = 40 * 1024 * 1024
_MAX_BLOCK_ROWS = 64 * 1024


def _round_up(n, m):
    return ((n + m - 1) // m) * m


def _mlp_kernel(x_ref, w1_ref, b1_ref, w2t_ref, b2_ref, o_ref, *, compute_dtype):
    # First linear on the MXU, f32 accumulate.  The optional bf16 cast happens
    # on the VMEM tile (no extra HBM traffic; fewer MXU passes than f32 inputs).
    x = x_ref[...].astype(compute_dtype)
    w1 = w1_ref[...].astype(compute_dtype)
    h = jnp.dot(x, w1, preferred_element_type=jnp.float32)          # (tb, 18)
    h = h + b1_ref[...]                                             # (1, 18) bcast
    h = jnp.maximum(h, _NEG_SLOPE * h)                              # LeakyReLU
    # Second linear as (1,18) . (tb,18)^T on the MXU -> (1, tb): the tb per-row
    # outputs land on the lane axis, so the store below is lane-dense.
    y = jax.lax.dot_general(
        w2t_ref[...], h,
        dimension_numbers=(((1,), (1,)), ((), ())),
        preferred_element_type=jnp.float32)                         # (1, tb)
    y = y + b2_ref[...]                                             # (1, 1) bcast
    o_ref[...] = y.reshape(o_ref.shape).astype(o_ref.dtype)         # (1, 1, tb)


def _pick_groups_per_block(num_groups, hid, itemsize):
    """128-row groups per grid step: divides num_groups, fits the VMEM budget."""
    # Conservative VMEM estimate per row: the hid lane dim pads to 128 lanes in
    # VMEM; the (1, tb) f32 output block pads to 8 sublanes.  Both double-buffered.
    bytes_per_row = 2 * (_round_up(hid, 128) * itemsize + 8 * 4)
    cap_rows = max(128, min(_MAX_BLOCK_ROWS, _VMEM_BLOCK_BUDGET // bytes_per_row))
    cap = max(1, cap_rows // 128)
    if num_groups >= 2:
        # Keep >= 2 grid steps so both v7x TensorCores get work.
        cap = min(cap, max(1, num_groups // 2))
    cap = min(cap, num_groups)
    for g in range(cap, 0, -1):
        if num_groups % g == 0:
            return g
    return 1


def _mlp_jnp(x, w1, b1, w2t, b2):
    h = jnp.dot(x.astype(jnp.float32), w1) + b1
    h = jnp.maximum(h, _NEG_SLOPE * h)
    return jnp.dot(h, w2t.T) + b2


@functools.partial(jax.jit, static_argnames=("use_bf16",))
def mlp_forward(x, w1, b1, w2, b2, *, use_bf16=False):
    """x: (B, hid); w1: (hid, 18); b1: (1, 18); w2: (18, 1); b2: (1, 1) -> (B, 1) f32."""
    B, hid = x.shape
    w1_in = w1.reshape(hid, _HIDDEN).astype(jnp.float32)
    b1_in = b1.reshape(1, _HIDDEN).astype(jnp.float32)
    w2t_in = w2.reshape(_HIDDEN, 1).T.astype(jnp.float32)           # (1, 18)
    b2_in = b2.reshape(1, 1).astype(jnp.float32)

    compute_dtype = jnp.bfloat16 if use_bf16 else jnp.float32

    num_groups = B // 128
    outs = []
    b_main = 0
    if num_groups > 0:
        gb = _pick_groups_per_block(num_groups, hid, x.dtype.itemsize)
        tb = gb * 128
        num_blocks = num_groups // gb
        b_main = num_blocks * tb                                    # == num_groups*128

        flops = 2 * b_main * _HIDDEN * (hid + 1) + 3 * b_main * _HIDDEN
        bytes_accessed = (b_main * hid * x.dtype.itemsize + b_main * 4
                          + (hid * _HIDDEN + 2 * _HIDDEN + 1) * 4)

        out_main = pl.pallas_call(
            functools.partial(_mlp_kernel, compute_dtype=compute_dtype),
            out_shape=jax.ShapeDtypeStruct((num_blocks, 1, tb), jnp.float32),
            grid_spec=pltpu.PrefetchScalarGridSpec(
                num_scalar_prefetch=0,
                grid=(num_blocks,),
                in_specs=[
                    pl.BlockSpec((tb, hid), lambda i: (i, 0)),        # x: batch tile
                    pl.BlockSpec((hid, _HIDDEN), lambda i: (0, 0)),   # w1 (whole)
                    pl.BlockSpec((1, _HIDDEN), lambda i: (0, 0)),     # b1
                    pl.BlockSpec((1, _HIDDEN), lambda i: (0, 0)),     # w2^T
                    pl.BlockSpec((1, 1), lambda i: (0, 0)),           # b2
                ],
                out_specs=pl.BlockSpec((1, 1, tb), lambda i: (i, 0, 0)),
            ),
            compiler_params=pltpu.CompilerParams(
                dimension_semantics=("parallel",),
                vmem_limit_bytes=_VMEM_LIMIT_BYTES,
            ),
            cost_estimate=pl.CostEstimate(
                flops=flops, transcendentals=0, bytes_accessed=bytes_accessed),
        )(x, w1_in, b1_in, w2t_in, b2_in)
        # Block-major order == batch order, so this reshape is free (no HBM pass).
        outs.append(out_main.reshape(b_main, 1))

    if b_main < B:
        # < 128 leftover rows (or B < 128 entirely): tiny plain-jnp tail instead
        # of padding the whole array in HBM.
        outs.append(_mlp_jnp(x[b_main:], w1_in, b1_in, w2t_in, b2_in))

    return outs[0] if len(outs) == 1 else jnp.concatenate(outs, axis=0)


def init_params(key, hid):
    # Deterministic init mimicking PyTorch Linear default (U(+-1/sqrt(fan_in))).
    k1, k2, k3, k4 = jax.random.split(key, 4)
    bound1 = 1.0 / (hid ** 0.5)
    w1 = jax.random.uniform(k1, (hid, _HIDDEN), jnp.float32, -bound1, bound1)
    b1 = jax.random.uniform(k2, (1, _HIDDEN), jnp.float32, -bound1, bound1)
    bound2 = 1.0 / (_HIDDEN ** 0.5)
    w2 = jax.random.uniform(k3, (_HIDDEN, 1), jnp.float32, -bound2, bound2)
    b2 = jax.random.uniform(k4, (1, 1), jnp.float32, -bound2, bound2)
    return w1, b1, w2, b2


def mlp_reference(x, w1, b1, w2, b2):
    h = jnp.dot(x, w1, precision=jax.lax.Precision.HIGHEST) + b1.reshape(1, -1)
    h = jnp.where(h >= 0, h, _NEG_SLOPE * h)
    return jnp.dot(h, w2.reshape(-1, 1),
                   precision=jax.lax.Precision.HIGHEST) + b2.reshape(1, 1)


if __name__ == "__main__":
    key = jax.random.PRNGKey(0)
    kx, kp = jax.random.split(key)

    # Small but non-trivial shapes: enough rows for a multi-step grid.
    B, hid = 256, 32
    x = jax.random.normal(kx, (B, hid), jnp.float32)
    w1, b1, w2, b2 = init_params(kp, hid)

    ref = mlp_reference(x, w1, b1, w2, b2)

    # Default f32 path: matches the PyTorch module's numerics (MXU accumulation
    # order differs, so allclose rather than bitwise).
    out = jax.block_until_ready(mlp_forward(x, w1, b1, w2, b2, use_bf16=False))
    assert out.shape == (B, 1)
    assert jnp.allclose(out, ref, atol=1e-5, rtol=1e-5)

    # Optional bf16-input fast path (cast happens inside the kernel).
    out_bf16 = jax.block_until_ready(mlp_forward(x, w1, b1, w2, b2, use_bf16=True))
    assert out_bf16.shape == (B, 1)
    assert jnp.allclose(out_bf16, ref, atol=5e-2, rtol=5e-2)

    # Non-multiple-of-128 batch: kernel main path + tiny jnp tail.
    B2 = 200
    out2 = jax.block_until_ready(mlp_forward(x[:B2], w1, b1, w2, b2))
    assert out2.shape == (B2, 1)
    assert jnp.allclose(out2, ref[:B2], atol=1e-5, rtol=1e-5)

    print("KERNEL_OK")
</pallas_src>

<mosaic_0001>
module attributes {stable_mosaic.version = 11 : i64} {
  func.func @_mlp_kernel(%arg0: i32, %arg1: memref<128x32xf32, #tpu.memory_space<vmem>>, %arg2: memref<32x18xf32, #tpu.memory_space<vmem>>, %arg3: memref<1x18xf32, #tpu.memory_space<vmem>>, %arg4: memref<1x18xf32, #tpu.memory_space<vmem>>, %arg5: memref<1x1xf32, #tpu.memory_space<vmem>>, %arg6: memref<1x1x128xf32, #tpu.memory_space<vmem>>) attributes {dimension_semantics = [#tpu.dimension_semantics<parallel>], iteration_bounds = array<i64: 2>, scalar_prefetch = 0 : i64, scratch_operands = 0 : i64, tpu.core_type = #tpu.core_type<tc>, window_params = [{transform_indices = @transform_0, window_bounds = array<i64: 128, 32>}, {pipeline_mode = #tpu.pipeline_mode<synchronous>, transform_indices = @transform_1, window_bounds = array<i64: 32, 18>}, {pipeline_mode = #tpu.pipeline_mode<synchronous>, transform_indices = @transform_2, window_bounds = array<i64: 1, 18>}, {pipeline_mode = #tpu.pipeline_mode<synchronous>, transform_indices = @transform_3, window_bounds = array<i64: 1, 18>}, {pipeline_mode = #tpu.pipeline_mode<synchronous>, transform_indices = @transform_4, window_bounds = array<i64: 1, 1>}, {transform_indices = @transform_5, window_bounds = array<i64: 1, 1, 128>}]} {
    %c0 = arith.constant 0 : index
    %c0_0 = arith.constant 0 : index
    %0 = vector.load %arg1[%c0, %c0_0] : memref<128x32xf32, #tpu.memory_space<vmem>>, vector<128x32xf32>
    %c0_1 = arith.constant 0 : index
    %c0_2 = arith.constant 0 : index
    %1 = vector.load %arg2[%c0_1, %c0_2] : memref<32x18xf32, #tpu.memory_space<vmem>>, vector<32x18xf32>
    %cst = arith.constant dense<0.000000e+00> : vector<128x18xf32>
    %2 = tpu.matmul %0, %1, %cst {dimension_numbers = #tpu.dot_dimension_numbers<[1], [0], [0], [1], [0, 0, 1, 1], [], []>} : vector<128x32xf32>, vector<32x18xf32>, vector<128x18xf32> -> vector<128x18xf32>
    %c0_3 = arith.constant 0 : index
    %c0_4 = arith.constant 0 : index
    %3 = vector.load %arg3[%c0_3, %c0_4] : memref<1x18xf32, #tpu.memory_space<vmem>>, vector<1x18xf32>
    %4 = vector.broadcast %3 : vector<1x18xf32> to vector<128x18xf32>
    %5 = arith.addf %2, %4 : vector<128x18xf32>
    %cst_5 = arith.constant 0.00999999977 : f32
    %6 = vector.broadcast %cst_5 : f32 to vector<128x18xf32>
    %7 = arith.mulf %6, %5 : vector<128x18xf32>
    %8 = arith.maximumf %5, %7 : vector<128x18xf32>
    %c0_6 = arith.constant 0 : index
    %c0_7 = arith.constant 0 : index
    %9 = vector.load %arg4[%c0_6, %c0_7] : memref<1x18xf32, #tpu.memory_space<vmem>>, vector<1x18xf32>
    %cst_8 = arith.constant dense<0.000000e+00> : vector<1x128xf32>
    %10 = tpu.matmul %9, %8, %cst_8 {dimension_numbers = #tpu.dot_dimension_numbers<[1], [1], [0], [0], [0, 0, 1, 0], [], []>} : vector<1x18xf32>, vector<128x18xf32>, vector<1x128xf32> -> vector<1x128xf32>
    %c0_9 = arith.constant 0 : index
    %c0_10 = arith.constant 0 : index
    %11 = vector.load %arg5[%c0_9, %c0_10] : memref<1x1xf32, #tpu.memory_space<vmem>>, vector<1x1xf32>
    %12 = vector.broadcast %11 : vector<1x1xf32> to vector<1x128xf32>
    %13 = arith.addf %10, %12 : vector<1x128xf32>
    %14 = vector.shape_cast %13 : vector<1x128xf32> to vector<1x1x128xf32>
    %c0_11 = arith.constant 0 : index
    %c0_12 = arith.constant 0 : index
    %c0_13 = arith.constant 0 : index
    %15 = vector.load %arg6[%c0_11, %c0_12, %c0_13] : memref<1x1x128xf32, #tpu.memory_space<vmem>>, vector<1x1x128xf32>
    tpu.vector_store %arg6[%c0_11, %c0_12, %c0_13], %14 {strides = array<i32>} : memref<1x1x128xf32, #tpu.memory_space<vmem>>, vector<1x1x128xf32>,
    return
  }
  func.func @transform_0(%arg0: i32) -> (i32, i32) {
    %c0_i32 = arith.constant 0 : i32
    %c0_i32_0 = arith.constant 0 : i32
    return %arg0, %c0_i32 : i32, i32
  }
  func.func @transform_1(%arg0: i32) -> (i32, i32) {
    %c0_i32 = arith.constant 0 : i32
    %c0_i32_0 = arith.constant 0 : i32
    %c0_i32_1 = arith.constant 0 : i32
    return %c0_i32, %c0_i32_0 : i32, i32
  }
  func.func @transform_2(%arg0: i32) -> (i32, i32) {
    %c0_i32 = arith.constant 0 : i32
    %c0_i32_0 = arith.constant 0 : i32
    %c0_i32_1 = arith.constant 0 : i32
    return %c0_i32, %c0_i32_0 : i32, i32
  }
  func.func @transform_3(%arg0: i32) -> (i32, i32) {
    %c0_i32 = arith.constant 0 : i32
    %c0_i32_0 = arith.constant 0 : i32
    %c0_i32_1 = arith.constant 0 : i32
    return %c0_i32, %c0_i32_0 : i32, i32
  }
  func.func @transform_4(%arg0: i32) -> (i32, i32) {
    %c0_i32 = arith.constant 0 : i32
    %c0_i32_0 = arith.constant 0 : i32
    %c0_i32_1 = arith.constant 0 : i32
    return %c0_i32, %c0_i32_0 : i32, i32
  }
  func.func @transform_5(%arg0: i32) -> (i32, i32, i32) {
    %c0_i32 = arith.constant 0 : i32
    %c0_i32_0 = arith.constant 0 : i32
    %c0_i32_1 = arith.constant 0 : i32
    return %arg0, %c0_i32, %c0_i32_0 : i32, i32, i32
  }
}

</mosaic_0001>

<bundles_post_ra>
// kernel: mlp_forward.1
= control target key start
LH: loop header
LB: loop body
LE: loop exit
PB: predicated region body
PF: predicated region fallthrough
CT: control target
= control target key end

     0   :  { %s1178_s0 = inlined_call_operand.vmem [shape: f32[256,32], index: 0, kind: input, shape index: {}]   ;;  %s1179_s1 = inlined_call_operand.vmem [shape: f32[32,18], index: 1, kind: input, shape index: {}]   ;;  %s1180_s2 = inlined_call_operand.vmem [shape: f32[1,18], index: 2, kind: input, shape index: {}]   ;;  %s1181_s3 = inlined_call_operand.vmem [shape: f32[1,18], index: 3, kind: input, shape index: {}]   ;;  %s1182_s4 = inlined_call_operand.<no memory space> [shape: f32[1,1], index: 4, kind: input, shape index: {}]   ;;  %s1183_s5 = inlined_call_operand.hbm [shape: f32[2,1,128], index: 5, kind: output, shape index: {}]  }
   0x1   :  { %v10_v0 = vstv %s1182_s4 }
   0x2   :  { %11 = vst [vmem:[#allocation2] sm:$0x1] %v10_v0 }
   0x3   :  { %12 = vsyncpa [#allocation4], 0 }
   0x4   :  { %14 = vsyncpa [#allocation4 + $0x1], 0  ;;  %s970_s20 = smov 0   ;;  %s972_s21 = smov 0  }
   0x5   :  { %s974_s22 = smov 0   ;;  %s976_s23 = smov 0  }
   0x6 LB: > { %s680_s4 = sadd.s32 4294967295, %s931_s23   ;;  %s681_s24 = sadd.s32 4294967294, %s931_s23   ;;  %s931_s23 = sphi %s976_s23, %s1189_s23   ;;  %s927_s22 = sphi %s974_s22, %s1188_s22   ;;  %s923_s21 = sphi %s972_s21, %s1187_s21   ;;  %s919_s20 = sphi %s970_s20, %s1186_s20  }
   0x7   : > { %s993_s25 = sadd.s32 1, %s931_s23   ;;  %s137_s26 = sadd.s32 1, %s927_s22 }
   0x8   : > { %s134_s27 = ssub.s32 %s931_s23, %s993_s25  ;;  %p147_p0 = scmp.ne.s32.totalorder %s927_s22, %s923_s21 }
   0x9   : > { %p135_p1 = scmp.eq.s32.totalorder %s134_s27, 0  ;;  %p148_p2 = scmp.eq.s32.totalorder %s680_s4, 1 }
   0xa   : > { %p153_p3 = scmp.ne.s32.totalorder %s923_s21, %s919_s20  ;;  %p154_p4 = scmp.eq.s32.totalorder %s681_s24, 1 }
   0xb   : > { %s1003_s28 = scalar_select %p135_p1, %s927_s22, %s137_s26  }
   0xc   : > { %p1005_p5 = por %p148_p2, %p147_p0  ;;  %p1009_p6 = por %p154_p4, %p153_p3 }
   0xd   : > { %p684_p7 = scmp.ge.s32.totalorder %s931_s23, 1  ;;  %p193_p8 = scmp.lt.s32.totalorder %s931_s23, 3 }
   0xf   : > { %p194_p9 = pnand %p684_p7, %p193_p8 }
  0x10   : > { %s1021_s10 = sshll.u32 (!%p194_p9), %s680_s4, 4  ;;  %s218_s6 = sand.u32 (!%p194_p9), 1, %s923_s21  }
  0x11   : > { %197 = sbr.rel (%p194_p9) target bundleno = 529 (0x211), region = 40  ;;  %p221_p10 = scmp.lt.s32.totalorder (!%p194_p9), %s1021_s10, 31 }
  0x12   : > { %s219_s7 = scalar_lea.vmem (!%p194_p9), [#allocation3], %s218_s6  ;;  %s1143_s12 = scalar_lea.hbm (!%p194_p9), %s1183_s5, %s1021_s10 }
  0x13   : > { %s626_s8 = sshll.u32 (!%p194_p9), %s219_s7, 4  ;;  %s936_s15 = smov (!%p194_p9), [#allocation3]   ;;  %s627_s8 = int_to_ptr.vmem [resolvable:$true] %s626_s8 }
  0x14   : > { %s871_s14 = scalar_lea.vmem (!%p194_p9), %s627_s8, 16 }
  0x15   : > { %p872_p11 = scmp.ne.s32.totalorder (!%p194_p9), %s627_s8, %s871_s14 }
  0x16   : > { %v245_v1 = vld [vmem:[%s1179_s1 + $0x18] sm:$0xff]  ;;  %v244_v2 = vld [vmem:[%s1179_s1 + $0x10] sm:$0xff]  ;;  %v243_v3 = vld [vmem:[%s1179_s1 + $0x8] sm:$0xff]  ;;  %s222_s13 = scalar_select %p221_p10, %s1021_s10, 31  ;;  %vm253_vm0 = vcmask 261120   ;;  %v933_v21 = vmov 0.0  }
  0x17   : > { %761 = vmatprep.subr.mxu0 %v245_v1  ;;  %v242_v4 = vld [vmem:[%s1179_s1] sm:$0xff]  ;;  %793 = vmatprep.subr.mxu1 %v933_v21  ;;  %vm934_vm1 = vmmov 0   ;;  %v935_v23 = vmov 0   ;;  %vm490_vm2 = vcmask 146432   ;;  %p873_p12 = pnand %p872_p11, %p1005_p5 }
  0x18   : > { %762 = vmatpush3.msra.mxu0 %v245_v1  ;;  %s686_s16 = sshll.u32 %s222_s13, 3  ;;  %825 = vmatprep.mubr.msk.f32.mxu1 %vm934_vm1, %v933_v21  ;;  %v480_v22 = vld [vmem:[#allocation2] sm:$0x1]  ;;  %s614_s13 = scalar_lea.sflag [#allocation4], %s218_s6 }
  0x19   : > { %763 = vmatprep.subr.mxu0 %v244_v2  ;;  %s1034_s19 = scalar_lea.vmem %s1178_s0, %s686_s16  ;;  %870 = vset.pattern.permute.xlu0 %v935_v23  ;;  %v1081_v38 = vld [vmem:[%s1180_s2] ss:$0 sm:$0xff]  ;;  %p874_p13 = pneg %p873_p12 }
  0x1a   : > { %764 = vmatpush3.msra.mxu0 %v244_v2  ;;  %v226_v5 = vld [vmem:[%s1034_s19] sm:$0xff]  ;;  %v227_v6 = vld [vmem:[%s1034_s19 + $0x8] sm:$0xff]  ;;  %v228_v7 = vld [vmem:[%s1034_s19 + $0x10] sm:$0xff]  ;;  %483 = vperm.xlu0 %870, %v480_v22   ;;  %s875_s16 = sshll.u32 %s936_s15, 4  ;;  %s876_s16 = int_to_ptr.vmem [resolvable:$false] %s875_s16 }
  0x1b   : > { %765 = vmatprep.subr.mxu0 %v243_v3  ;;  %769 = vmatprep.mubr.msk.f32.mxu0 %vm253_vm0, %v226_v5  ;;  %v229_v8 = vld [vmem:[%s1034_s19 + $0x18] sm:$0xff]  ;;  %v230_v9 = vld [vmem:[%s1034_s19 + $0x20] sm:$0xff]  ;;  %v231_v10 = vld [vmem:[%s1034_s19 + $0x28] sm:$0xff]  ;;  %s877_s17 = scalar_lea.vmem %s876_s16, 32  ;;  %p878_p0 = scmp.lt.s32.totalorder %s627_s8, %s876_s16 }
  0x1c   : > { %766 = vmatpush3.msra.mxu0 %v243_v3  ;;  %v232_v11 = vld [vmem:[%s1034_s19 + $0x30] sm:$0xff]  ;;  %v233_v12 = vld [vmem:[%s1034_s19 + $0x38] sm:$0xff]  ;;  %v234_v13 = vld [vmem:[%s1034_s19 + $0x40] sm:$0xff]  ;;  %p879_p1 = scmp.lt.s32.totalorder %s877_s17, %s871_s14 }
  0x1d   : > { %767 = vmatprep.subr.mxu0 %v242_v4  ;;  %v235_v14 = vld [vmem:[%s1034_s19 + $0x48] sm:$0xff]  ;;  %v236_v15 = vld [vmem:[%s1034_s19 + $0x50] sm:$0xff]  ;;  %v237_v16 = vld [vmem:[%s1034_s19 + $0x58] sm:$0xff] }
  0x1e   : > { %768 = vmatpush3.msra.mxu0 %v242_v4  ;;  %v238_v17 = vld [vmem:[%s1034_s19 + $0x60] sm:$0xff]  ;;  %v239_v18 = vld [vmem:[%s1034_s19 + $0x68] sm:$0xff]  ;;  %v240_v19 = vld [vmem:[%s1034_s19 + $0x70] sm:$0xff]  ;;  %p880_p2 = por %p879_p1, %p878_p0 }
  0x1f   : > { %770 = vmatmul.mubr.msk.f32.vlgmr.msra.gmra.mxu0 %vm253_vm0, %v227_v6  ;;  %v241_v20 = vld [vmem:[%s1034_s19 + $0x78] sm:$0xff] }
  0x20   : > { %772 = vmatprep.mubr.msk.f32.mxu0 %vm253_vm0, %v228_v7  ;;  %p881_p3 = pnand %p880_p2, %p874_p13 }
  0x23   : > { %773 = vmatmul.mubr.msk.f32.gmra.mxu0 %vm253_vm0, %v229_v8 }
  0x24   : > { %775 = vmatprep.mubr.msk.f32.mxu0 %vm253_vm0, %v230_v9 }
  0x27   : > { %776 = vmatmul.mubr.msk.f32.gmra.mxu0 %vm253_vm0, %v231_v10 }
  0x28   : > { %778 = vmatprep.mubr.msk.f32.mxu0 %vm253_vm0, %v232_v11 }
  0x2b   : > { %779 = vmatmul.mubr.msk.f32.gmra.mxu0 %vm253_vm0, %v233_v12 }
  0x2c   : > { %781 = vmatprep.mubr.msk.f32.mxu0 %vm253_vm0, %v234_v13 }
  0x2f   : > { %782 = vmatmul.mubr.msk.f32.gmra.mxu0 %vm253_vm0, %v235_v14 }
  0x30   : > { %784 = vmatprep.mubr.msk.f32.mxu0 %vm253_vm0, %v236_v15 }
  0x33   : > { %785 = vmatmul.mubr.msk.f32.gmra.mxu0 %vm253_vm0, %v237_v16 }
  0x34   : > { %787 = vmatprep.mubr.msk.f32.mxu0 %vm253_vm0, %v238_v17 }
  0x37   : > { %788 = vmatmul.mubr.msk.f32.gmra.mxu0 %vm253_vm0, %v239_v18 }
  0x38   : > { %790 = vmatprep.mubr.msk.f32.mxu0 %vm253_vm0, %v240_v19 }
  0x3b   : > { %791 = vmatmul.mubr.msk.f32.gmra.mxu0 %vm253_vm0, %v241_v20 }
  0xdf   : > { %v1070_v24 = vpop.f32.mrf.mxu0 }
  0xe0   : > { %v374_v16 = vadd.f32 %v1070_v24, %v1081_v38 }
  0xe1   : > { %v1072_v25 = vpop.f32.mrf.mxu0 }
  0xe2   : > { %v448_v19 = vmul.f32 0.01, %v374_v16  ;;  %v369_v20 = vadd.f32 %v1081_v38, %v1072_v25  ;;  %v486_v25 = vlaneseq }
  0xe3   : > { %v1074_v26 = vpop.f32.mrf.mxu0 }
  0xe4   : > { %v384_v10 = vadd.f32 %v1074_v26, %v1081_v38  ;;  %v464_v23 = vmax.f32 %v374_v16, %v448_v19  ;;  %v447_v26 = vmul.f32 0.01, %v369_v20 }
  0xe5   : > { %v1076_v27 = vpop.f32.mrf.mxu0 }
  0xe6   : > { %v450_v13 = vmul.f32 0.01, %v384_v10  ;;  %v379_v14 = vadd.f32 %v1081_v38, %v1076_v27  ;;  %v463_v24 = vmax.f32 %v369_v20, %v447_v26  ;;  %v479_v27 = vld [vmem:[%s1181_s3] sm:$0x1] }
  0xe7   : > { %v777_v28 = vpop.f32.mrf.mxu0 }
  0xe8   : > { %v394_v4 = vadd.f32 %v777_v28, %v1081_v38  ;;  %v466_v17 = vmax.f32 %v384_v10, %v450_v13  ;;  %v449_v18 = vmul.f32 0.01, %v379_v14  ;;  %v487_v28 = vshrl.u32 %v486_v25, 7 }
  0xe9   : > { %v388_v29 = vpop.f32.mrf.mxu0 }
  0xea   : > { %v452_v7 = vmul.f32 0.01, %v394_v4  ;;  %v389_v8 = vadd.f32 %v1081_v38, %v388_v29  ;;  %v465_v22 = vmax.f32 %v379_v14, %v449_v18  ;;  %v488_v29 = vsub.s32 0, %v487_v28 }
  0xeb   : > { %v780_v30 = vpop.f32.mrf.mxu0 }
  0xec   : > { %v404_v62 = vadd.f32 %v780_v30, %v1081_v38  ;;  %v468_v11 = vmax.f32 %v394_v4, %v452_v7  ;;  %v451_v12 = vmul.f32 0.01, %v389_v8  ;;  %v484_v30 = vpop.permute.xlu0 %483 }
  0xed   : > { %v398_v31 = vpop.f32.mrf.mxu0 }
  0xee   : > { %v454_v1 = vmul.f32 0.01, %v404_v62  ;;  %v399_v2 = vadd.f32 %v1081_v38, %v398_v31  ;;  %v467_v15 = vmax.f32 %v389_v8, %v451_v12  ;;  %v489_v31 = vrot.slane %v484_v30, %v488_v29 }
  0xef   : > { %v783_v32 = vpop.f32.mrf.mxu0 }
  0xf0   : > { %v414_v56 = vadd.f32 %v783_v32, %v1081_v38  ;;  %v470_v5 = vmax.f32 %v404_v62, %v454_v1  ;;  %v453_v6 = vmul.f32 0.01, %v399_v2 }
  0xf1   : > { %v408_v33 = vpop.f32.mrf.mxu0 }
  0xf2   : > { %v456_v59 = vmul.f32 0.01, %v414_v56  ;;  %v409_v60 = vadd.f32 %v1081_v38, %v408_v33  ;;  %v469_v9 = vmax.f32 %v399_v2, %v453_v6 }
  0xf3   : > { %v786_v34 = vpop.f32.mrf.mxu0 }
  0xf4   : > { %v424_v50 = vadd.f32 %v786_v34, %v1081_v38  ;;  %v472_v63 = vmax.f32 %v414_v56, %v456_v59  ;;  %v455_v0 = vmul.f32 0.01, %v409_v60 }
  0xf5   : > { %v418_v35 = vpop.f32.mrf.mxu0 }
  0xf6   : > { %v458_v53 = vmul.f32 0.01, %v424_v50  ;;  %v419_v54 = vadd.f32 %v1081_v38, %v418_v35  ;;  %v471_v3 = vmax.f32 %v409_v60, %v455_v0 }
  0xf7   : > { %v789_v36 = vpop.f32.mrf.mxu0 }
  0xf8   : > { %v434_v44 = vadd.f32 %v789_v36, %v1081_v38  ;;  %v474_v57 = vmax.f32 %v424_v50, %v458_v53  ;;  %v457_v58 = vmul.f32 0.01, %v419_v54 }
  0xf9   : > { %v428_v37 = vpop.f32.mrf.mxu0 }
  0xfa   : > { %v460_v47 = vmul.f32 0.01, %v434_v44  ;;  %v429_v48 = vadd.f32 %v1081_v38, %v428_v37  ;;  %v473_v61 = vmax.f32 %v419_v54, %v457_v58 }
  0xfb   : > { %v792_v39 = vpop.f32.mrf.mxu0 }
  0xfc   : > { %v444_v40 = vadd.f32 %v792_v39, %v1081_v38  ;;  %v476_v51 = vmax.f32 %v434_v44, %v460_v47  ;;  %v459_v52 = vmul.f32 0.01, %v429_v48 }
  0xfd   : > { %v438_v41 = vpop.f32.mrf.mxu0 }
  0xfe   : > { %v462_v42 = vmul.f32 0.01, %v444_v40  ;;  %v439_v43 = vadd.f32 %v1081_v38, %v438_v41  ;;  %v475_v55 = vmax.f32 %v429_v48, %v459_v52 }
 0x100   : > { %v478_v45 = vmax.f32 %v444_v40, %v462_v42  ;;  %v461_v46 = vmul.f32 0.01, %v439_v43 }
 0x102   : > { %794 = vmatpush3.xpose.msk.msra.mxu1 %vm490_vm2, %v478_v45  ;;  %v477_v49 = vmax.f32 %v439_v43, %v461_v46 }
 0x103   : > { %795 = vmatprep.subr.mxu1 %v933_v21 }
 0x106   : > { %796 = vmatpush3.xpose.msk.msra.mxu1 %vm490_vm2, %v477_v49 }
 0x107   : > { %797 = vmatprep.subr.mxu1 %v933_v21 }
 0x10a   : > { %798 = vmatpush3.xpose.msk.msra.mxu1 %vm490_vm2, %v476_v51 }
 0x10b   : > { %799 = vmatprep.subr.mxu1 %v933_v21 }
 0x10e   : > { %800 = vmatpush3.xpose.msk.msra.mxu1 %vm490_vm2, %v475_v55 }
 0x10f   : > { %801 = vmatprep.subr.mxu1 %v933_v21 }
 0x112   : > { %802 = vmatpush3.xpose.msk.msra.mxu1 %vm490_vm2, %v474_v57 }
 0x113   : > { %803 = vmatprep.subr.mxu1 %v933_v21 }
 0x116   : > { %804 = vmatpush3.xpose.msk.msra.mxu1 %vm490_vm2, %v473_v61 }
 0x117   : > { %805 = vmatprep.subr.mxu1 %v933_v21 }
 0x11a   : > { %806 = vmatpush3.xpose.msk.msra.mxu1 %vm490_vm2, %v472_v63 }
 0x11b   : > { %807 = vmatprep.subr.mxu1 %v933_v21 }
 0x11e   : > { %808 = vmatpush3.xpose.msk.msra.mxu1 %vm490_vm2, %v471_v3 }
 0x11f   : > { %809 = vmatprep.subr.mxu1 %v933_v21 }
 0x122   : > { %810 = vmatpush3.xpose.msk.msra.mxu1 %vm490_vm2, %v470_v5 }
 0x123   : > { %811 = vmatprep.subr.mxu1 %v933_v21 }
 0x126   : > { %812 = vmatpush3.xpose.msk.msra.mxu1 %vm490_vm2, %v469_v9 }
 0x127   : > { %813 = vmatprep.subr.mxu1 %v933_v21 }
 0x12a   : > { %814 = vmatpush3.xpose.msk.msra.mxu1 %vm490_vm2, %v468_v11 }
 0x12b   : > { %815 = vmatprep.subr.mxu1 %v933_v21 }
 0x12e   : > { %816 = vmatpush3.xpose.msk.msra.mxu1 %vm490_vm2, %v467_v15 }
 0x12f   : > { %817 = vmatprep.subr.mxu1 %v933_v21 }
 0x132   : > { %818 = vmatpush3.xpose.msk.msra.mxu1 %vm490_vm2, %v466_v17 }
 0x133   : > { %819 = vmatprep.subr.mxu1 %v933_v21 }
 0x136   : > { %820 = vmatpush3.xpose.msk.msra.mxu1 %vm490_vm2, %v465_v22 }
 0x137   : > { %821 = vmatprep.subr.mxu1 %v933_v21 }
 0x13a   : > { %822 = vmatpush3.xpose.msk.msra.mxu1 %vm490_vm2, %v464_v23 }
 0x13b   : > { %823 = vmatprep.subr.mxu1 %v933_v21 }
 0x13e   : > { %824 = vmatpush3.xpose.msk.msra.mxu1 %vm490_vm2, %v463_v24 }
 0x141   : > { %826 = vmatmul.mubr.msk.f32.vlgmr.msra.gmra.mxu1 %vm490_vm2, %v479_v27 }
 0x201   : > { %v608_v32 = vpop.f32.mrf.mxu1 }
 0x202   : > { %v609_v21 = vadd.f32 %v608_v32, %v489_v31 }
 0x203   : > { %v827_v33 = vpop.f32.mrf.mxu1 }
 0x204   : > { %612 = vst [vmem:[%s219_s7] sm:$0x1] %v609_v21 }
 0x205   : > { %884 = shalt.err (!%p881_p3)
}
 0x206   : > { %s885_s10 = scalar_lea.hbm %s1143_s12, 16  ;;  %s889_s4 = scalar_lea.hbm %s1183_s5, 32 }
 0x207   : > { %p886_p4 = scmp.ne.s32.totalorder %s1143_s12, %s885_s10  ;;  %p890_p9 = scmp.lt.s32.totalorder %s1143_s12, %s1183_s5 }
 0x208   : > { %p891_p10 = scmp.lt.s32.totalorder %s889_s4, %s885_s10 }
 0x209   : > { %p887_p7 = pnand %p886_p4, %p1005_p5 }
 0x20a   : > { %p892_p11 = por %p891_p10, %p890_p9 }
 0x20b   : > { %p888_p8 = pneg %p887_p7 }
 0x20d   : > { %p893_p12 = pnand %p892_p11, %p888_p8 }
 0x20f   : > { %896 = shalt.err (!%p893_p12)
}
 0x210   : > { %828 = dma.vmem_to_hbm [thread:$0]  (%p1005_p5), %s627_s8, 16, %s1143_s12, %s614_s13  }
 0x211 PF: > { %p834_p13 = scmp.ge.s32.totalorder %s931_s23, 2  ;;  %s638_s27 = sand.u32 1, %s919_s20  }
 0x212   : > { %s639_s6 = scalar_lea.sflag [#allocation4], %s638_s27 }
 0x213   : > { %p831_p0 = pnand %p834_p13, %p1009_p6 }
 0x215   : > { %p832_p1 = pneg %p831_p0 }
 0x217   : > { %914 = dma.done.wait (%p832_p1), %s639_s6, 16  }
 0x218   : > { %916 = vsyncadd (%p832_p1), %s639_s6, 4294967280  ;;  %p17_p2 = scmp.ge.s32.totalorder %s993_s25, 4   ;;  %s1186_s20 = smov %s923_s21 }
 0x219   : > { %s1187_s21 = smov %s927_s22  ;;  %s1188_s22 = smov %s1003_s28 }
 0x21a   : > { %s1189_s23 = smov %s993_s25  ;;  %19 = sbr.rel (!%p17_p2) target bundleno = 6 (0x6), region = 75 }
 0x21f   :  { %643 = vsyncpa [#allocation4], 1 }
 0x220   :  { %645 = vsyncpa [#allocation4 + $0x1], 1 }

</bundles_post_ra>
